<compile_context>
chip_gen: v7x
topology: tpu7x:2x2x1
jax: 0.10.0
libtpu: 0.0.40
codegen_flags: <defaults>
</compile_context>

<pallas_src>
import jax
import jax.numpy as jnp
from jax.experimental import pallas as pl
from jax.experimental.pallas import tpu as pltpu

IN_FEATURES = 768
OUT_FEATURES = 47
PADDED_OUT = 128          # lane-dense output width (multiple of 128)


def _round_up(n, m):
    return ((n + m - 1) // m) * m


def _linear_sigmoid_kernel(x_ref, w_ref, b_ref, o_ref):
    # x_ref: (TB, 768)   w_ref: (768, 128)   b_ref: (1, 128)   o_ref: (TB, 128)
    logits = jnp.dot(x_ref[...], w_ref[...],
                     preferred_element_type=jnp.float32) + b_ref[...]
    # jax.nn.sigmoid: exp goes to the EUP, remaining ops are cheap; keeps VALU
    # slots free in this DMA-bound kernel.
    o_ref[...] = jax.nn.sigmoid(logits).astype(o_ref.dtype)


def attention_sentiment_classifier(x, weight_t, bias, *,
                                   block_b=None,
                                   return_padded=False):
    """Forward pass of AttentionSentimentClassifier.

    Args:
      x:        (B, 1, 768) or (B, 768) activations (f32 or bf16 — the matmul
                dtype follows x; x is never cast in the wrapper).
      weight_t: (768, 47) = nn.Linear weight transposed (x @ weight_t + bias).
      bias:     (47,).
      block_b:  optional batch tile size override (rows per grid step).
      return_padded: if True, return the (B, 128) lane-padded output so the
                [:, :47] slice can be fused into the consumer (saves an extra
                HBM pass over the output of this mem-bound kernel).

    Returns:
      (B, 47) float32 probabilities (or (B, 128) if return_padded).
    """
    x2d = x.reshape(x.shape[0], -1)            # flatten(1)
    B = x2d.shape[0]
    assert x2d.shape[1] == IN_FEATURES
    assert weight_t.shape == (IN_FEATURES, OUT_FEATURES)
    assert bias.shape == (OUT_FEATURES,)

    # Matmul dtype follows x. Only the tiny weight is cast (free); casting x
    # here would add a full read+write HBM pass and defeat the purpose.
    if weight_t.dtype != x2d.dtype:
        weight_t = weight_t.astype(x2d.dtype)

    itemsize = jnp.dtype(x2d.dtype).itemsize
    sublane = 32 // itemsize                   # 8 for f32, 16 for bf16
    if block_b is None:
        # ~3 MiB of x per tile regardless of dtype.
        block_b = 1024 * (4 // itemsize)

    # Zero-pad output features 47 -> 128 for lane-dense stores (tiny arrays).
    w_pad = jnp.zeros((IN_FEATURES, PADDED_OUT), weight_t.dtype)
    w_pad = w_pad.at[:, :OUT_FEATURES].set(weight_t)
    b_pad = jnp.zeros((1, PADDED_OUT), jnp.float32)
    b_pad = b_pad.at[0, :OUT_FEATURES].set(bias.astype(jnp.float32))

    # Batch tile: dtype-native sublane multiple, capped at block_b, and small
    # enough that modest batches still yield >= 2 grid steps so the "parallel"
    # axis can be split across both TensorCores on v7x.
    tb = min(block_b, max(sublane, _round_up(pl.cdiv(B, 2), sublane)))
    grid = (pl.cdiv(B, tb),)                   # ragged last block: no jnp.pad

    # Only raise the scoped-VMEM limit if the requested tiles actually need it
    # (default tiles fit v5e's 16 MiB scoped default with room to spare).
    vmem_est = (2 * tb * IN_FEATURES * itemsize        # double-buffered x
                + 2 * tb * PADDED_OUT * 4              # double-buffered out
                + 2 * IN_FEATURES * PADDED_OUT * itemsize
                + 2 * PADDED_OUT * 4)
    extra = {}
    if vmem_est > 12 * 1024 * 1024:
        extra["vmem_limit_bytes"] = min(2 * vmem_est, 128 * 1024 * 1024)

    out = pl.pallas_call(
        _linear_sigmoid_kernel,
        out_shape=jax.ShapeDtypeStruct((B, PADDED_OUT), jnp.float32),
        grid_spec=pltpu.PrefetchScalarGridSpec(
            num_scalar_prefetch=0,
            grid=grid,
            in_specs=[
                # x: one batch tile per grid step (double-buffered DMA).
                pl.BlockSpec((tb, IN_FEATURES), lambda i: (i, 0)),
                # Weight / bias: same block every step -> VMEM-resident.
                # (pipeline_mode=pl.Buffered(1) would reclaim their second
                #  buffer; unnecessary at these tile sizes.)
                pl.BlockSpec((IN_FEATURES, PADDED_OUT), lambda i: (0, 0)),
                pl.BlockSpec((1, PADDED_OUT), lambda i: (0, 0)),
            ],
            out_specs=pl.BlockSpec((tb, PADDED_OUT), lambda i: (i, 0)),
        ),
        compiler_params=pltpu.CompilerParams(
            # Independent batch tiles: eligible for the 2-TC split on v7x.
            dimension_semantics=("parallel",),
            **extra),
    )(x2d, w_pad, b_pad)

    if return_padded:
        return out                              # consumer fuses the [:, :47]
    return out[:, :OUT_FEATURES]


if __name__ == "__main__":
    key = jax.random.PRNGKey(0)
    k_x, k_w, k_b = jax.random.split(key, 3)

    B = 2
    # Input matching the module: (batch, 1, 768) -> flatten(1) -> (batch, 768)
    x = jax.random.normal(k_x, (B, 1, IN_FEATURES), dtype=jnp.float32)

    # Deterministic parameter init (Kaiming-uniform-ish bounds like nn.Linear).
    bound = 1.0 / (IN_FEATURES ** 0.5)
    weight = jax.random.uniform(k_w, (OUT_FEATURES, IN_FEATURES),
                                minval=-bound, maxval=bound,
                                dtype=jnp.float32)
    bias = jax.random.uniform(k_b, (OUT_FEATURES,),
                              minval=-bound, maxval=bound,
                              dtype=jnp.float32)
    weight_t = weight.T  # (768, 47) so the kernel computes x @ W^T

    # Pure-JAX reference.
    ref = jax.nn.sigmoid(x.reshape(B, -1) @ weight_t + bias[None, :])

    # 1) f32 path — bit-faithful to the PyTorch module, tight tolerance.
    out_f32 = jax.block_until_ready(
        attention_sentiment_classifier(x, weight_t, bias))
    assert out_f32.shape == (B, OUT_FEATURES)
    assert jnp.allclose(out_f32, ref, atol=1e-5, rtol=1e-5)

    # 2) bf16 *input* path — x arrives already bf16 from its producer, so the
    #    kernel reads half the bytes; no wrapper-side cast is performed.
    x_bf16 = x.astype(jnp.bfloat16)
    ref_bf16 = jax.nn.sigmoid(
        x_bf16.astype(jnp.float32).reshape(B, -1) @ weight_t + bias[None, :])
    out_bf16 = jax.block_until_ready(
        attention_sentiment_classifier(x_bf16, weight_t, bias))
    assert out_bf16.shape == (B, OUT_FEATURES)
    assert jnp.allclose(out_bf16, ref_bf16, atol=2e-2, rtol=2e-2)

    # 3) Ragged batch (B=10, tb=8 -> 2 grid steps, partial last block) — checks
    #    the no-padding path end to end.
    B2 = 10
    x2 = jax.random.normal(jax.random.PRNGKey(1), (B2, 1, IN_FEATURES),
                           dtype=jnp.float32)
    ref2 = jax.nn.sigmoid(x2.reshape(B2, -1) @ weight_t + bias[None, :])
    out2 = jax.block_until_ready(
        attention_sentiment_classifier(x2, weight_t, bias, block_b=8))
    assert out2.shape == (B2, OUT_FEATURES)
    assert jnp.allclose(out2, ref2, atol=1e-5, rtol=1e-5)

    print("KERNEL_OK")
</pallas_src>

<mosaic_0001>
module attributes {stable_mosaic.version = 11 : i64} {
  func.func @_linear_sigmoid_kernel(%arg0: i32, %arg1: memref<8x768xf32, #tpu.memory_space<vmem>>, %arg2: memref<768x128xf32, #tpu.memory_space<vmem>>, %arg3: memref<1x128xf32, #tpu.memory_space<vmem>>, %arg4: memref<8x128xf32, #tpu.memory_space<vmem>>) attributes {dimension_semantics = [#tpu.dimension_semantics<parallel>], iteration_bounds = array<i64: 1>, scalar_prefetch = 0 : i64, scratch_operands = 0 : i64, tpu.core_type = #tpu.core_type<tc>, window_params = [{transform_indices = @transform_0, window_bounds = array<i64: 8, 768>}, {pipeline_mode = #tpu.pipeline_mode<synchronous>, transform_indices = @transform_1, window_bounds = array<i64: 768, 128>}, {pipeline_mode = #tpu.pipeline_mode<synchronous>, transform_indices = @transform_2, window_bounds = array<i64: 1, 128>}, {transform_indices = @transform_3, window_bounds = array<i64: 8, 128>}]} {
    %c0 = arith.constant 0 : index
    %c0_0 = arith.constant 0 : index
    %0 = vector.load %arg1[%c0, %c0_0] : memref<8x768xf32, #tpu.memory_space<vmem>>, vector<8x768xf32>
    %c0_1 = arith.constant 0 : index
    %c0_2 = arith.constant 0 : index
    %1 = vector.load %arg2[%c0_1, %c0_2] : memref<768x128xf32, #tpu.memory_space<vmem>>, vector<768x128xf32>
    %cst = arith.constant dense<0.000000e+00> : vector<8x128xf32>
    %2 = tpu.matmul %0, %1, %cst {dimension_numbers = #tpu.dot_dimension_numbers<[1], [0], [0], [1], [0, 0, 1, 1], [], []>} : vector<8x768xf32>, vector<768x128xf32>, vector<8x128xf32> -> vector<8x128xf32>
    %c0_3 = arith.constant 0 : index
    %c0_4 = arith.constant 0 : index
    %3 = vector.load %arg3[%c0_3, %c0_4] : memref<1x128xf32, #tpu.memory_space<vmem>>, vector<1x128xf32>
    %4 = vector.broadcast %3 : vector<1x128xf32> to vector<8x128xf32>
    %5 = arith.addf %2, %4 : vector<8x128xf32>
    %6 = arith.negf %5 : vector<8x128xf32>
    %7 = math.exp %6 : vector<8x128xf32>
    %cst_5 = arith.constant 1.000000e+00 : f32
    %8 = vector.broadcast %cst_5 : f32 to vector<8x128xf32>
    %9 = arith.addf %8, %7 : vector<8x128xf32>
    %10 = arith.divf %8, %9 : vector<8x128xf32>
    %c0_6 = arith.constant 0 : index
    %c0_7 = arith.constant 0 : index
    %11 = vector.load %arg4[%c0_6, %c0_7] : memref<8x128xf32, #tpu.memory_space<vmem>>, vector<8x128xf32>
    tpu.vector_store %arg4[%c0_6, %c0_7], %10 {strides = array<i32>} : memref<8x128xf32, #tpu.memory_space<vmem>>, vector<8x128xf32>,
    return
  }
  func.func @transform_0(%arg0: i32) -> (i32, i32) {
    %c0_i32 = arith.constant 0 : i32
    %c0_i32_0 = arith.constant 0 : i32
    return %arg0, %c0_i32 : i32, i32
  }
  func.func @transform_1(%arg0: i32) -> (i32, i32) {
    %c0_i32 = arith.constant 0 : i32
    %c0_i32_0 = arith.constant 0 : i32
    %c0_i32_1 = arith.constant 0 : i32
    return %c0_i32, %c0_i32_0 : i32, i32
  }
  func.func @transform_2(%arg0: i32) -> (i32, i32) {
    %c0_i32 = arith.constant 0 : i32
    %c0_i32_0 = arith.constant 0 : i32
    %c0_i32_1 = arith.constant 0 : i32
    return %c0_i32, %c0_i32_0 : i32, i32
  }
  func.func @transform_3(%arg0: i32) -> (i32, i32) {
    %c0_i32 = arith.constant 0 : i32
    %c0_i32_0 = arith.constant 0 : i32
    return %arg0, %c0_i32 : i32, i32
  }
}

</mosaic_0001>

<bundles_post_ra>
// kernel: tpu_custom_call.1
= control target key start
LH: loop header
LB: loop body
LE: loop exit
PB: predicated region body
PF: predicated region fallthrough
CT: control target
= control target key end

     0   :  { %8 = vsyncpa [#allocation3], 0  ;;  %s831_s0 = inlined_call_operand.hbm [shape: f32[2,768], index: 0, kind: input, shape index: {}]   ;;  %s832_s1 = inlined_call_operand.hbm [shape: f32[768,128], index: 1, kind: input, shape index: {}]   ;;  %s833_s2 = inlined_call_operand.vmem [shape: f32[1,128], index: 2, kind: input, shape index: {}]   ;;  %s834_s3 = inlined_call_operand.hbm [shape: f32[2,128], index: 3, kind: output, shape index: {}]  }
   0x1   :  { %9 = vsyncpa [#allocation6], 0 }
   0x2   :  { %10 = vsyncpa [#allocation4], 0 }
   0x3   :  { %15 = vsyncadd [#allocation3], 576  ;;  %s754_s12 = smov [#allocation2]   ;;  %s682_s16 = scalar_lea.hbm %s831_s0, 192 }
   0x4   :  { %s16_s13 = sshll.u32 %s754_s12, 4  ;;  %p683_p0 = scmp.ne.s32.totalorder %s831_s0, %s682_s16  ;;  %s17_s13 = int_to_ptr.vmem [resolvable:$true] %s16_s13 }
   0x5   :  { %p686_p1 = scmp.lt.u32.totalorder %s682_s16, %s831_s0 }
   0x7   :  { %p688_p2 = pnand %p686_p1, %p683_p0 }
   0x9   :  { %691 = shalt.err (!%p688_p2)
}
   0xa   :  { %s692_s21 = scalar_lea.vmem %s17_s13, 192  ;;  %s696_s22 = scalar_lea.vmem %s17_s13, 768 }
   0xb   :  { %p693_p3 = scmp.ne.s32.totalorder %s17_s13, %s692_s21  ;;  %p697_p4 = scmp.lt.s32.totalorder %s17_s13, %s17_s13 }
   0xc   :  { %p698_p5 = scmp.lt.s32.totalorder %s696_s22, %s692_s21 }
   0xe   :  { %p699_p6 = por %p698_p5, %p697_p4 }
  0x10   :  { %p700_p7 = pnand %p699_p6, %p693_p3 }
  0x12   :  { %703 = shalt.err (!%p700_p7)
}
  0x13   :  { %s755_s23 = smov 192   ;;  %s756_s24 = smov 12  }
  0x14   :  { %22 = dma.hbm_to_vmem [thread:$0]  %s831_s0, 192, %s17_s13, [#allocation3], %s755_s23, %s755_s23, %s756_s24  }
  0x15   :  { %s757_s27 = smov [#allocation5]   ;;  %s704_s4 = scalar_lea.hbm %s832_s1, 12288 }
  0x16   :  { %s28_s28 = sshll.u32 %s757_s27, 4  ;;  %p705_p8 = scmp.ne.s32.totalorder %s832_s1, %s704_s4  ;;  %s29_s28 = int_to_ptr.vmem [resolvable:$true] %s28_s28 }
  0x17   :  { %p708_p9 = scmp.lt.u32.totalorder %s704_s4, %s832_s1 }
  0x19   :  { %p710_p10 = pnand %p708_p9, %p705_p8 }
  0x1b   :  { %713 = shalt.err (!%p710_p10)
}
  0x1c   :  { %s714_s9 = scalar_lea.vmem %s29_s28, 12288  ;;  %p719_p12 = scmp.lt.s32.totalorder %s29_s28, %s29_s28 }
  0x1d   :  { %p715_p11 = scmp.ne.s32.totalorder %s29_s28, %s714_s9  ;;  %p720_p13 = scmp.lt.s32.totalorder %s714_s9, %s714_s9 }
  0x1f   :  { %p721_p0 = por %p720_p13, %p719_p12 }
  0x21   :  { %p722_p1 = pnand %p721_p0, %p715_p11 }
  0x23   :  { %725 = shalt.err (!%p722_p1)
}
  0x24   :  { %s758_s0 = smov 128   ;;  %s759_s10 = smov 8  }
  0x25   :  { %34 = dma.hbm_to_vmem [thread:$0]  %s832_s1, 12288, %s29_s28, [#allocation6], %s758_s0, %s758_s0, %s759_s10  }
  0x26   :  { %748 = dma.done.wait [#allocation3], 768  }
  0x27   :  { %749 = vsyncadd [#allocation3], 4294966528 }
  0x28   :  { %750 = dma.done.wait [#allocation6], 12288  }
  0x29   :  { %751 = vsyncadd [#allocation6], 4294955008  ;;  %v67_v0 = vld [vmem:[#allocation5 + $0x80] sm:$0xff]  ;;  %v68_v1 = vld [vmem:[#allocation5 + $0x88] sm:$0xff]  ;;  %v760_v51 = vmov 1983009808   ;;  %v169_v53 = vlaneseq }
  0x2a   :  { %v51_v2 = vld [vmem:[#allocation5] sm:$0xff]  ;;  %v564_v3 = vpack.c.bf16 %v68_v1, %v67_v0  ;;  %v52_v4 = vld [vmem:[#allocation5 + $0x8] sm:$0xff]  ;;  %v69_v11 = vld [vmem:[#allocation5 + $0x90] sm:$0xff]  ;;  %v167_v52 = vunpack.c.l.s4 %v760_v51 }
  0x2b   :  { %v99_v5 = vld [vmem:[#allocation5 + $0x180] sm:$0xff]  ;;  %v100_v6 = vld [vmem:[#allocation5 + $0x188] sm:$0xff]  ;;  %v566_v7 = vpack.c.bf16 %v52_v4, %v51_v2  ;;  %v70_v13 = vld [vmem:[#allocation5 + $0x98] sm:$0xff] }
  0x2c   :  { %v596_v8 = vpack.c.bf16 %v100_v6, %v99_v5  ;;  %v83_v9 = vld [vmem:[#allocation5 + $0x100] sm:$0xff]  ;;  %v84_v10 = vld [vmem:[#allocation5 + $0x108] sm:$0xff]  ;;  %565 = vmatprep.subr.bf16.mxu0 %v564_v3  ;;  %v53_v14 = vld [vmem:[#allocation5 + $0x10] sm:$0xff]  ;;  %v568_v16 = vpack.c.bf16 %v70_v13, %v69_v11  ;;  %v168_v2 = vunpack.c.0.s8 %v167_v52  ;;  %v170_v3 = vshrl.u32 %v169_v53, 7 }
  0x2d   :  { %v598_v12 = vpack.c.bf16 %v84_v10, %v83_v9  ;;  %v54_v15 = vld [vmem:[#allocation5 + $0x18] sm:$0xff]  ;;  %567 = vmatpush3.bf16.msra.mxu0 %v566_v7  ;;  %v101_v18 = vld [vmem:[#allocation5 + $0x190] sm:$0xff]  ;;  %v71_v23 = vld [vmem:[#allocation5 + $0xa0] sm:$0xff] }
  0x2e   :  { %597 = vmatprep.subr.bf16.mxu1 %v596_v8  ;;  %v570_v17 = vpack.c.bf16 %v54_v15, %v53_v14  ;;  %v102_v19 = vld [vmem:[#allocation5 + $0x198] sm:$0xff]  ;;  %v85_v20 = vld [vmem:[#allocation5 + $0x110] sm:$0xff]  ;;  %v72_v24 = vld [vmem:[#allocation5 + $0xa8] sm:$0xff]  ;;  %569 = vmatprep.subr.bf16.mxu0 %v568_v16 }
  0x2f   :  { %599 = vmatpush3.bf16.msra.mxu1 %v598_v12  ;;  %v600_v21 = vpack.c.bf16 %v102_v19, %v101_v18  ;;  %v86_v22 = vld [vmem:[#allocation5 + $0x118] sm:$0xff]  ;;  %v572_v26 = vpack.c.bf16 %v72_v24, %v71_v23  ;;  %v55_v27 = vld [vmem:[#allocation5 + $0x20] sm:$0xff]  ;;  %v56_v28 = vld [vmem:[#allocation5 + $0x28] sm:$0xff] }
  0x30   :  { %v602_v25 = vpack.c.bf16 %v86_v22, %v85_v20  ;;  %v103_v29 = vld [vmem:[#allocation5 + $0x1a0] sm:$0xff]  ;;  %v104_v30 = vld [vmem:[#allocation5 + $0x1a8] sm:$0xff]  ;;  %v574_v33 = vpack.c.bf16 %v56_v28, %v55_v27  ;;  %v73_v35 = vld [vmem:[#allocation5 + $0xb0] sm:$0xff] }
  0x31   :  { %601 = vmatprep.subr.bf16.mxu1 %v600_v21  ;;  %v87_v31 = vld [vmem:[#allocation5 + $0x120] sm:$0xff]  ;;  %v88_v32 = vld [vmem:[#allocation5 + $0x128] sm:$0xff]  ;;  %571 = vmatpush3.bf16.msra.mxu0 %v570_v17  ;;  %v604_v34 = vpack.c.bf16 %v104_v30, %v103_v29  ;;  %v74_v36 = vld [vmem:[#allocation5 + $0xb8] sm:$0xff]  ;;  %v808_v21 = vsub.s32 %v168_v2, %v170_v3 }
  0x32   :  { %v57_v37 = vld [vmem:[#allocation5 + $0x30] sm:$0xff]  ;;  %573 = vmatprep.subr.bf16.mxu0 %v572_v26  ;;  %v606_v38 = vpack.c.bf16 %v88_v32, %v87_v31  ;;  %v576_v39 = vpack.c.bf16 %v74_v36, %v73_v35  ;;  %v58_v40 = vld [vmem:[#allocation5 + $0x38] sm:$0xff]  ;;  %v75_v46 = vld [vmem:[#allocation5 + $0xc0] sm:$0xff] }
  0x33   :  { %603 = vmatpush3.bf16.msra.mxu1 %v602_v25  ;;  %v105_v41 = vld [vmem:[#allocation5 + $0x1b0] sm:$0xff]  ;;  %v106_v42 = vld [vmem:[#allocation5 + $0x1b8] sm:$0xff]  ;;  %v76_v47 = vld [vmem:[#allocation5 + $0xc8] sm:$0xff]  ;;  %v578_v48 = vpack.c.bf16 %v58_v40, %v57_v37 }
  0x34   :  { %605 = vmatprep.subr.bf16.mxu1 %v604_v34  ;;  %v608_v43 = vpack.c.bf16 %v106_v42, %v105_v41  ;;  %v89_v44 = vld [vmem:[#allocation5 + $0x130] sm:$0xff]  ;;  %v90_v45 = vld [vmem:[#allocation5 + $0x138] sm:$0xff]  ;;  %v107_v49 = vld [vmem:[#allocation5 + $0x1c0] sm:$0xff]  ;;  %v580_v55 = vpack.c.bf16 %v76_v47, %v75_v46 }
  0x35   :  { %575 = vmatpush3.bf16.msra.mxu0 %v574_v33  ;;  %v108_v50 = vld [vmem:[#allocation5 + $0x1c8] sm:$0xff]  ;;  %v610_v54 = vpack.c.bf16 %v90_v45, %v89_v44  ;;  %v59_v56 = vld [vmem:[#allocation5 + $0x40] sm:$0xff]  ;;  %v77_v61 = vld [vmem:[#allocation5 + $0xd0] sm:$0xff] }
  0x36   :  { %577 = vmatprep.subr.bf16.mxu0 %v576_v39  ;;  %v60_v57 = vld [vmem:[#allocation5 + $0x48] sm:$0xff]  ;;  %v91_v58 = vld [vmem:[#allocation5 + $0x140] sm:$0xff]  ;;  %v612_v59 = vpack.c.bf16 %v108_v50, %v107_v49  ;;  %v78_v62 = vld [vmem:[#allocation5 + $0xd8] sm:$0xff] }
  0x37   :  { %607 = vmatpush3.bf16.msra.mxu1 %v606_v38  ;;  %v92_v60 = vld [vmem:[#allocation5 + $0x148] sm:$0xff]  ;;  %v109_v63 = vld [vmem:[#allocation5 + $0x1d0] sm:$0xff]  ;;  %v110_v0 = vld [vmem:[#allocation5 + $0x1d8] sm:$0xff]  ;;  %v582_v1 = vpack.c.bf16 %v60_v57, %v59_v56  ;;  %v584_v5 = vpack.c.bf16 %v78_v62, %v77_v61 }
  0x38   :  { %609 = vmatprep.subr.bf16.mxu1 %v608_v43  ;;  %v614_v4 = vpack.c.bf16 %v92_v60, %v91_v58  ;;  %v61_v6 = vld [vmem:[#allocation5 + $0x50] sm:$0xff]  ;;  %v62_v7 = vld [vmem:[#allocation5 + $0x58] sm:$0xff]  ;;  %v616_v9 = vpack.c.bf16 %v110_v0, %v109_v63  ;;  %v79_v11 = vld [vmem:[#allocation5 + $0xe0] sm:$0xff] }
  0x39   :  { %579 = vmatpush3.bf16.msra.mxu0 %v578_v48  ;;  %v93_v8 = vld [vmem:[#allocation5 + $0x150] sm:$0xff]  ;;  %v94_v10 = vld [vmem:[#allocation5 + $0x158] sm:$0xff]  ;;  %v80_v12 = vld [vmem:[#allocation5 + $0xe8] sm:$0xff]  ;;  %v586_v17 = vpack.c.bf16 %v62_v7, %v61_v6 }
  0x3a   :  { %581 = vmatprep.subr.bf16.mxu0 %v580_v55  ;;  %v63_v13 = vld [vmem:[#allocation5 + $0x60] sm:$0xff]  ;;  %v64_v14 = vld [vmem:[#allocation5 + $0x68] sm:$0xff]  ;;  %v81_v20 = vld [vmem:[#allocation5 + $0xf0] sm:$0xff]  ;;  %v618_v22 = vpack.c.bf16 %v94_v10, %v93_v8  ;;  %v588_v23 = vpack.c.bf16 %v80_v12, %v79_v11 }
  0x3b   :  { %611 = vmatpush3.bf16.msra.mxu1 %v610_v54  ;;  %v111_v15 = vld [vmem:[#allocation5 + $0x1e0] sm:$0xff]  ;;  %v112_v16 = vld [vmem:[#allocation5 + $0x1e8] sm:$0xff]  ;;  %v82_v25 = vld [vmem:[#allocation5 + $0xf8] sm:$0xff]  ;;  %v590_v30 = vpack.c.bf16 %v64_v14, %v63_v13 }
  0x3c   :  { %613 = vmatprep.subr.bf16.mxu1 %v612_v59  ;;  %v95_v18 = vld [vmem:[#allocation5 + $0x160] sm:$0xff]  ;;  %v96_v19 = vld [vmem:[#allocation5 + $0x168] sm:$0xff]  ;;  %v620_v24 = vpack.c.bf16 %v112_v16, %v111_v15  ;;  %v670_v26 = vld [vmem:[#allocation2] ss:$12 sps:$4 sm:$0xff]   ;;  %v592_v36 = vpack.c.bf16 %v82_v25, %v81_v20 }
  0x3d   :  { %583 = vmatpush3.bf16.msra.mxu0 %v582_v1  ;;  %v672_v27 = vld [vmem:[#allocation2 + $0x18] ss:$12 sps:$4 sm:$0xff]   ;;  %v114_v29 = vld [vmem:[#allocation5 + $0x1f8] sm:$0xff]  ;;  %v172_v31 = vrot.slane %v670_v26, %v808_v21  ;;  %v622_v35 = vpack.c.bf16 %v96_v19, %v95_v18  ;;  %v131_v43 = vld [vmem:[#allocation5 + $0x280] sm:$0xff] }
  0x3e   :  { %585 = vmatprep.subr.bf16.mxu0 %v584_v5  ;;  %v113_v28 = vld [vmem:[#allocation5 + $0x1f0] sm:$0xff]  ;;  %v186_v32 = vrot.slane %v672_v27, %v808_v21  ;;  %v675_v34 = vld [vmem:[#allocation2 + $0x1c] ss:$12 sps:$4 sm:$0xff]   ;;  %v115_v51 = vld [vmem:[#allocation5 + $0x200] sm:$0xff] }
  0x3f   :  { %615 = vmatpush3.bf16.msra.mxu1 %v614_v4  ;;  %v674_v33 = vld [vmem:[#allocation2 + $0x4] ss:$12 sps:$4 sm:$0xff]   ;;  %v66_v38 = vld [vmem:[#allocation5 + $0x78] sm:$0xff]  ;;  %v624_v40 = vpack.c.bf16 %v114_v29, %v113_v28  ;;  %v132_v44 = vld [vmem:[#allocation5 + $0x288] sm:$0xff]  ;;  %v193_v46 = vrot.slane %v675_v34, %v808_v21 }
  0x40   :  { %617 = vmatprep.subr.bf16.mxu1 %v616_v9  ;;  %v65_v37 = vld [vmem:[#allocation5 + $0x70] sm:$0xff]  ;;  %v195_v41 = vcombine.high %v172_v31, %v186_v32  ;;  %v98_v42 = vld [vmem:[#allocation5 + $0x178] sm:$0xff]  ;;  %v179_v45 = vrot.slane %v674_v33, %v808_v21  ;;  %v628_v50 = vpack.c.bf16 %v132_v44, %v131_v43  ;;  %v116_v52 = vld [vmem:[#allocation5 + $0x208] sm:$0xff]  ;;  %v194_v55 = vcombine.low %v172_v31, %v186_v32 }
  0x41   :  { %587 = vmatpush3.bf16.msra.mxu0 %v586_v17  ;;  %v97_v39 = vld [vmem:[#allocation5 + $0x170] sm:$0xff]  ;;  %v594_v47 = vpack.c.bf16 %v66_v38, %v65_v37  ;;  %v134_v54 = vld [vmem:[#allocation5 + $0x298] sm:$0xff]  ;;  %v630_v56 = vpack.c.bf16 %v116_v52, %v115_v51  ;;  %v135_v61 = vld [vmem:[#allocation5 + $0x2a0] sm:$0xff] }
  0x42   :  { %589 = vmatprep.subr.bf16.mxu0 %v588_v23  ;;  %286 = vmatprep.mubr.f32.mxu0 %v195_v41  ;;  %v197_v48 = vcombine.high %v179_v45, %v193_v46  ;;  %v626_v49 = vpack.c.bf16 %v98_v42, %v97_v39  ;;  %v133_v53 = vld [vmem:[#allocation5 + $0x290] sm:$0xff]  ;;  %v196_v57 = vcombine.low %v179_v45, %v193_v46  ;;  %v118_v60 = vld [vmem:[#allocation5 + $0x218] sm:$0xff]  ;;  %v136_v62 = vld [vmem:[#allocation5 + $0x2a8] sm:$0xff] }
  0x43   :  { %619 = vmatpush3.bf16.msra.mxu1 %v618_v22  ;;  %v632_v58 = vpack.c.bf16 %v134_v54, %v133_v53  ;;  %v117_v59 = vld [vmem:[#allocation5 + $0x210] sm:$0xff]  ;;  %v676_v0 = vld [vmem:[#allocation2 + $0x8] ss:$12 sps:$4 sm:$0xff]   ;;  %v636_v2 = vpack.c.bf16 %v136_v62, %v135_v61  ;;  %v120_v4 = vld [vmem:[#allocation5 + $0x228] sm:$0xff] }
  0x44   :  { %621 = vmatprep.subr.bf16.mxu1 %v620_v24  ;;  %356 = vmatprep.mubr.f32.mxu1 %v197_v48  ;;  %v634_v63 = vpack.c.bf16 %v118_v60, %v117_v59  ;;  %v677_v1 = vld [vmem:[#allocation2 + $0x20] ss:$12 sps:$4 sm:$0xff]   ;;  %v119_v3 = vld [vmem:[#allocation5 + $0x220] sm:$0xff]  ;;  %v206_v7 = vrot.slane %v676_v0, %v808_v21  ;;  %v140_v15 = vld [vmem:[#allocation5 + $0x2c8] sm:$0xff] }
  0x45   :  { %591 = vmatpush3.bf16.msra.mxu0 %v590_v30  ;;  %v137_v5 = vld [vmem:[#allocation5 + $0x2b0] sm:$0xff]  ;;  %v138_v6 = vld [vmem:[#allocation5 + $0x2b8] sm:$0xff]  ;;  %v213_v8 = vrot.slane %v677_v1, %v808_v21  ;;  %v638_v9 = vpack.c.bf16 %v120_v4, %v119_v3  ;;  %v139_v14 = vld [vmem:[#allocation5 + $0x2c0] sm:$0xff] }
  0x46   :  { %593 = vmatprep.subr.bf16.mxu0 %v592_v36  ;;  %v640_v11 = vpack.c.bf16 %v138_v6, %v137_v5  ;;  %v121_v12 = vld [vmem:[#allocation5 + $0x230] sm:$0xff]  ;;  %v122_v13 = vld [vmem:[#allocation5 + $0x238] sm:$0xff]  ;;  %v644_v17 = vpack.c.bf16 %v140_v15, %v139_v14  ;;  %v123_v18 = vld [vmem:[#allocation5 + $0x240] sm:$0xff] }
  0x47   :  { %623 = vmatpush3.bf16.msra.mxu1 %v622_v35  ;;  %v215_v10 = vcombine.high %v206_v7, %v213_v8  ;;  %v642_v16 = vpack.c.bf16 %v122_v13, %v121_v12  ;;  %v124_v19 = vld [vmem:[#allocation5 + $0x248] sm:$0xff]  ;;  %v141_v20 = vld [vmem:[#allocation5 + $0x2d0] sm:$0xff]  ;;  %v142_v22 = vld [vmem:[#allocation5 + $0x2d8] sm:$0xff]  ;;  %v214_v39 = vcombine.low %v206_v7, %v213_v8 }
  0x48   :  { %625 = vmatprep.subr.bf16.mxu1 %v624_v40  ;;  %v646_v21 = vpack.c.bf16 %v124_v19, %v123_v18  ;;  %v648_v23 = vpack.c.bf16 %v142_v22, %v141_v20  ;;  %v125_v24 = vld [vmem:[#allocation5 + $0x250] sm:$0xff]  ;;  %v126_v25 = vld [vmem:[#allocation5 + $0x258] sm:$0xff]  ;;  %v143_v26 = vld [vmem:[#allocation5 + $0x2e0] sm:$0xff] }
  0x49   :  { %595 = vmatpush3.bf16.msra.mxu0 %v594_v47  ;;  %v144_v27 = vld [vmem:[#allocation5 + $0x2e8] sm:$0xff]  ;;  %v650_v28 = vpack.c.bf16 %v126_v25, %v125_v24  ;;  %v127_v30 = vld [vmem:[#allocation5 + $0x260] sm:$0xff]  ;;  %v145_v32 = vld [vmem:[#allocation5 + $0x2f0] sm:$0xff] }
  0x4a   :  { %629 = vmatprep.subr.bf16.mxu0 %v628_v50  ;;  %v652_v29 = vpack.c.bf16 %v144_v27, %v143_v26  ;;  %v128_v31 = vld [vmem:[#allocation5 + $0x268] sm:$0xff]  ;;  %v146_v33 = vld [vmem:[#allocation5 + $0x2f8] sm:$0xff]  ;;  %v129_v36 = vld [vmem:[#allocation5 + $0x270] sm:$0xff] }
  0x4b   :  { %627 = vmatpush3.bf16.msra.mxu1 %v626_v49  ;;  %v654_v34 = vpack.c.bf16 %v128_v31, %v127_v30  ;;  %v656_v35 = vpack.c.bf16 %v146_v33, %v145_v32  ;;  %v130_v37 = vld [vmem:[#allocation5 + $0x278] sm:$0xff]  ;;  %v457_v41 = vld [vmem:[%s833_s2] ss:$0 sm:$0xff] }
  0x4c   :  { %287 = vmatmul.mubr.f32.vlgmr.msra.gmra.mrb[0].mxu0 %v194_v55  ;;  %v658_v38 = vpack.c.bf16 %v130_v37, %v129_v36 }
  0x4d   :  { %631 = vmatpush3.bf16.msra.mxu0 %v630_v56  ;;  %426 = vmatprep.mubr.f32.mxu0 %v215_v10 }
  0x4e   :  { %357 = vmatmul.mubr.f32.vlgmr.msra.gmra.mrb[0].mxu1 %v196_v57  ;;  %633 = vmatprep.subr.bf16.mxu0 %v632_v58 }
  0x51   :  { %635 = vmatpush3.bf16.msra.mxu0 %v634_v63 }
  0x52   :  { %637 = vmatprep.subr.bf16.mxu0 %v636_v2 }
  0x55   :  { %639 = vmatpush3.bf16.msra.mxu0 %v638_v9 }
  0x56   :  { %641 = vmatprep.subr.bf16.mxu0 %v640_v11 }
  0x59   :  { %643 = vmatpush3.bf16.msra.mxu0 %v642_v16 }
  0x5a   :  { %645 = vmatprep.subr.bf16.mxu0 %v644_v17 }
  0x5d   :  { %647 = vmatpush3.bf16.msra.mxu0 %v646_v21 }
  0x5e   :  { %649 = vmatprep.subr.bf16.mxu0 %v648_v23 }
  0x61   :  { %651 = vmatpush3.bf16.msra.mxu0 %v650_v28 }
  0x62   :  { %653 = vmatprep.subr.bf16.mxu0 %v652_v29 }
  0x65   :  { %655 = vmatpush3.bf16.msra.mxu0 %v654_v34 }
  0x66   :  { %657 = vmatprep.subr.bf16.mxu0 %v656_v35 }
  0x69   :  { %659 = vmatpush3.bf16.msra.mxu0 %v658_v38 }
  0x6c   :  { %427 = vmatmul.mubr.f32.vlgmr.msra.gmra.mrb[2].mxu0 %v214_v39 }
 0x11f   :  { %v491_v40 = vpop.f32.mrb[0].mxu0 }
 0x120   :  { %v492_v42 = vpop.f32.mrb[1].mxu0 }
 0x121   :  { %v526_v43 = vpop.f32.mrb[0].mxu1  ;;  %v493_v44 = vadd.f32 %v492_v42, %v491_v40 }
 0x122   :  { %v527_v45 = vpop.f32.mrb[1].mxu1 }
 0x123   :  { %v528_v46 = vadd.f32 %v527_v45, %v526_v43  ;;  %v289_v47 = vadd.f32 %v493_v44, %v457_v41 }
 0x125   :  { %v359_v48 = vadd.f32 %v528_v46, %v289_v47 }
 0x13f   :  { %v561_v49 = vpop.f32.mrb[2].mxu0 }
 0x140   :  { %v562_v50 = vpop.f32.mrb[3].mxu0 }
 0x141   :  { %v563_v51 = vadd.f32 %v562_v50, %v561_v49 }
 0x143   :  { %v429_v52 = vadd.f32 %v563_v51, %v359_v48 }
 0x145   :  { %v458_v53 = vmul.f32 -1.442695, %v429_v52 }
 0x147   :  { %678 = vpow2.f32 %v458_v53 }
 0x151   :  { %v679_v54 = vpop.eup %678 }
 0x152   :  { %v435_v55 = vadd.f32 1.0, %v679_v54 }
 0x154   :  { %680 = vrcp.f32 %v435_v55 }
 0x15e   :  { %v681_v56 = vpop.eup %680 }
 0x15f   :  { %438 = vst [vmem:[#allocation7] sm:$0xff] %v681_v56 }
 0x160   :  { %443 = vsyncadd [#allocation4], 96  ;;  %s761_s2 = smov [#allocation7]  }
 0x161   :  { %s444_s14 = sshll.u32 %s761_s2, 4  ;;  %s445_s14 = int_to_ptr.vmem [resolvable:$true] %s444_s14 }
 0x162   :  { %s726_s15 = scalar_lea.vmem %s445_s14, 32  ;;  %s730_s16 = scalar_lea.vmem %s445_s14, 128 }
 0x163   :  { %p727_p2 = scmp.ne.s32.totalorder %s445_s14, %s726_s15  ;;  %p731_p3 = scmp.lt.s32.totalorder %s445_s14, %s445_s14 }
 0x164   :  { %p732_p4 = scmp.lt.s32.totalorder %s730_s16, %s726_s15 }
 0x166   :  { %p733_p5 = por %p732_p4, %p731_p3 }
 0x168   :  { %p734_p6 = pnand %p733_p5, %p727_p2 }
 0x16a   :  { %737 = shalt.err (!%p734_p6)
}
 0x16b   :  { %s738_s19 = scalar_lea.hbm %s834_s3, 32 }
 0x16c   :  { %p739_p7 = scmp.ne.s32.totalorder %s834_s3, %s738_s19  ;;  %p742_p8 = scmp.lt.u32.totalorder %s738_s19, %s834_s3 }
 0x16e   :  { %p744_p9 = pnand %p742_p8, %p739_p7 }
 0x170   :  { %747 = shalt.err (!%p744_p9)
}
 0x171   :  { %s762_s24 = smov 32   ;;  %s763_s25 = smov 2  }
 0x172   :  { %450 = dma.vmem_to_hbm [thread:$0]  %s445_s14, 32, %s834_s3, [#allocation4], %s762_s24, %s762_s24, %s763_s25  }
 0x173   :  { %752 = dma.done.wait [#allocation4], 128  }
 0x174   :  { %753 = vsyncadd [#allocation4], 4294967168 }
 0x175   :  { %454 = vsyncpa [#allocation3], 1 }
 0x176   :  { %455 = vsyncpa [#allocation6], 1 }
 0x177   :  { %456 = vsyncpa [#allocation4], 1 }

</bundles_post_ra>
